<compile_context>
chip_gen: v6e
topology: v6e:2x2x1
jax: 0.10.0
libtpu: 0.0.40
codegen_flags: <defaults>
</compile_context>

<pallas_src>
import jax
import jax.numpy as jnp
from jax import lax
from jax.experimental import pallas as pl
from jax.experimental.pallas import tpu as pltpu


def _round_up(v, m):
    return (v + m - 1) // m * m


# ----------------------------- Pallas kernel -------------------------------
def _make_lora_conv_kernel(tap_offsets):
    """Kernel factory; tap_offsets are static flat offsets i*Wp + j per (i, j) tap."""

    def kernel(x_ref, w_ref, b_ref, o_ref):
        # x_ref: (1, C_in, L_in)       zero-padded image, spatial dims flattened
        # w_ref: (KH*KW, C_out, C_in)  folded (base + up@down) per-tap weight matrices
        # b_ref: (C_out, 1)            base conv bias
        # o_ref: (1, C_out, P_pad)     stride-1 conv output over the padded grid
        c_out = o_ref.shape[1]
        p_pad = o_ref.shape[2]
        acc = jnp.zeros((c_out, p_pad), jnp.float32)
        # Static unroll over the KH*KW taps: each tap is one lane-dense MXU matmul
        # against a shifted window of the flattened image (shift trick; stride-1).
        for t, off in enumerate(tap_offsets):
            acc = acc + jnp.dot(
                w_ref[t],
                x_ref[0, :, off:off + p_pad],
                preferred_element_type=jnp.float32,
            )
        # f32 epilogue (bias add); cast only at the store.
        o_ref[0] = (acc + b_ref[...]).astype(o_ref.dtype)

    return kernel


# ------------------------------- wrapper ------------------------------------
def lora_conv2d_forward(x, w_base, b_base, w_down, w_up, stride, padding,
                        vmem_limit_bytes=None):
    """x: [N, C_in, H, W] (NCHW). Returns [N, C_out, OH, OW] (NCHW)."""
    n, c_in, h, w = x.shape
    c_out, _, kh, kw = w_base.shape
    sh, sw = stride
    ph, pw = padding

    # --- Fold the LoRA residual into the base weight (exact: W_up is 1x1 / stride-1):
    #     conv(conv(x, W_down, s, p), W_up) == conv(x, W_up @ W_down, s, p)
    w_eff = w_base + jnp.einsum('or,rcij->ocij', w_up[:, :, 0, 0], w_down)
    w_eff = w_eff.astype(x.dtype)
    # Per-tap weight matrices, tap-major: [KH*KW, C_out, C_in]. These blocks are
    # constant across grid steps and tiny after the fold; for very large C_in*C_out on
    # v7x (64 MiB VMEM) they could additionally be single-buffered or staged to scratch.
    w_taps = w_eff.transpose(2, 3, 0, 1).reshape(kh * kw, c_out, c_in)
    bias = b_base.reshape(c_out, 1).astype(jnp.float32)

    # --- Activation layout: zero-pad spatially, flatten (Hp, Wp) -> Hp*Wp so the
    # spatial axis sits on lanes; extra zero tail so every shifted window is in bounds
    # and the minor dims are multiples of 128 (lane-dense loads/stores).
    hp, wp = h + 2 * ph, w + 2 * pw
    oh1, ow1 = hp - kh + 1, wp - kw + 1            # stride-1 output extent
    p_pad = _round_up(oh1 * wp, 128)               # lane-dense output width
    max_off = (kh - 1) * wp + (kw - 1)
    l_in = _round_up(max_off + p_pad, 128)
    xp = jnp.pad(x, ((0, 0), (0, 0), (ph, ph), (pw, pw))).reshape(n, c_in, hp * wp)
    xp = jnp.pad(xp, ((0, 0), (0, 0), (0, l_in - hp * wp)))

    tap_offsets = tuple(i * wp + j for i in range(kh) for j in range(kw))
    kernel = _make_lora_conv_kernel(tap_offsets)

    # Grid over batch: one image per step (KiB..MiB of VMEM per step at the feature-map
    # sizes this module targets); axis is "parallel" so megacore/TC sharding applies.
    # TODO(synk): for very large feature maps, add a second grid axis over row chunks
    # of the flattened spatial dim with a (KH-1)-row halo (manual async_copy), so a
    # single image need not be fully VMEM-resident.
    out_flat = pl.pallas_call(
        kernel,
        out_shape=jax.ShapeDtypeStruct((n, c_out, p_pad), x.dtype),
        grid_spec=pltpu.PrefetchScalarGridSpec(
            num_scalar_prefetch=0,
            grid=(n,),
            in_specs=[
                pl.BlockSpec((1, c_in, l_in), lambda b: (b, 0, 0)),
                pl.BlockSpec((kh * kw, c_out, c_in), lambda b: (0, 0, 0)),
                pl.BlockSpec((c_out, 1), lambda b: (0, 0)),
            ],
            out_specs=pl.BlockSpec((1, c_out, p_pad), lambda b: (b, 0, 0)),
        ),
        compiler_params=pltpu.CompilerParams(
            dimension_semantics=("parallel",),
            vmem_limit_bytes=vmem_limit_bytes,
        ),
    )(xp, w_taps, bias)

    # Valid stride-1 outputs live at flat index oh*Wp + ow (ow < OW1); the remaining
    # padded-grid columns are junk and sliced away here. Result is already NCHW — no
    # full-tensor transpose at the end.
    out1 = out_flat[:, :, :oh1 * wp].reshape(n, c_out, oh1, wp)[:, :, :, :ow1]
    # A stride-s conv (same padding) is the stride-1 conv subsampled; for the demo's
    # stride (1, 1) this is a no-op view.
    return out1[:, :, ::sh, ::sw]


# ------------------------------- reference ---------------------------------
def lora_conv2d_ref(x, w_base, b_base, w_down, w_up, stride, padding):
    dn = lax.conv_dimension_numbers(x.shape, w_base.shape, ("NCHW", "OIHW", "NCHW"))
    pad = [(padding[0], padding[0]), (padding[1], padding[1])]
    orig = lax.conv_general_dilated(x, w_base, stride, pad, dimension_numbers=dn)
    orig = orig + b_base.reshape(1, -1, 1, 1)
    down = lax.conv_general_dilated(x, w_down, stride, pad, dimension_numbers=dn)
    dn2 = lax.conv_dimension_numbers(down.shape, w_up.shape, ("NCHW", "OIHW", "NCHW"))
    up = lax.conv_general_dilated(down, w_up, (1, 1), [(0, 0), (0, 0)],
                                  dimension_numbers=dn2)
    return orig + up


# --------------------------------- main -------------------------------------
if __name__ == "__main__":
    # Module hyperparameters (small, consistent with the PyTorch __init__):
    #   base_layer = nn.Conv2d(in_channels=4, out_channels=8, kernel_size=3,
    #                          stride=1, padding=1, bias=True)
    #   rank = 8
    N, C_in, H, W = 2, 4, 16, 16
    C_out, KH, KW = 8, 3, 3
    rank = 8
    stride = (1, 1)
    padding = (1, 1)

    key = jax.random.PRNGKey(0)
    kx, kw_b, kb_b, kd, ku = jax.random.split(key, 5)

    x = jax.random.normal(kx, (N, C_in, H, W), jnp.float32)
    w_base = jax.random.normal(kw_b, (C_out, C_in, KH, KW), jnp.float32) * 0.1
    b_base = jax.random.normal(kb_b, (C_out,), jnp.float32) * 0.1
    # lora_down ~ randn / rank (matching __init__); lora_up comes from weight_dict in
    # the PyTorch forward, so initialize it deterministically (nonzero) here.
    w_down = jax.random.normal(kd, (rank, C_in, KH, KW), jnp.float32) / rank
    w_up = jax.random.normal(ku, (C_out, rank, 1, 1), jnp.float32) * 0.1

    out = lora_conv2d_forward(x, w_base, b_base, w_down, w_up, stride, padding)
    out = jax.block_until_ready(out)

    ref = lora_conv2d_ref(x, w_base, b_base, w_down, w_up, stride, padding)
    assert out.shape == (N, C_out, H, W), out.shape
    assert jnp.allclose(out, ref, rtol=1e-4, atol=1e-4), "mismatch vs reference"

    print("KERNEL_OK")
</pallas_src>

<mosaic_0001>
module attributes {stable_mosaic.version = 11 : i64} {
  func.func @kernel(%arg0: i32, %arg1: memref<1x4x512xf32, #tpu.memory_space<vmem>>, %arg2: memref<9x8x4xf32, #tpu.memory_space<vmem>>, %arg3: memref<8x1xf32, #tpu.memory_space<vmem>>, %arg4: memref<1x8x384xf32, #tpu.memory_space<vmem>>) attributes {dimension_semantics = [#tpu.dimension_semantics<parallel>], iteration_bounds = array<i64: 2>, scalar_prefetch = 0 : i64, scratch_operands = 0 : i64, tpu.core_type = #tpu.core_type<tc>, window_params = [{transform_indices = @transform_0, window_bounds = array<i64: 1, 4, 512>}, {pipeline_mode = #tpu.pipeline_mode<synchronous>, transform_indices = @transform_1, window_bounds = array<i64: 9, 8, 4>}, {pipeline_mode = #tpu.pipeline_mode<synchronous>, transform_indices = @transform_2, window_bounds = array<i64: 8, 1>}, {transform_indices = @transform_3, window_bounds = array<i64: 1, 8, 384>}]} {
    %cst = arith.constant 0.000000e+00 : f32
    %0 = vector.broadcast %cst : f32 to vector<8x384xf32>
    %c0 = arith.constant 0 : index
    %c0_0 = arith.constant 0 : index
    %c0_1 = arith.constant 0 : index
    %1 = vector.load %arg2[%c0, %c0_0, %c0_1] : memref<9x8x4xf32, #tpu.memory_space<vmem>>, vector<1x8x4xf32>
    %2 = vector.shape_cast %1 : vector<1x8x4xf32> to vector<8x4xf32>
    %c0_2 = arith.constant 0 : index
    %c0_3 = arith.constant 0 : index
    %c0_4 = arith.constant 0 : index
    %3 = vector.load %arg1[%c0_2, %c0_3, %c0_4] : memref<1x4x512xf32, #tpu.memory_space<vmem>>, vector<1x4x384xf32>
    %4 = vector.shape_cast %3 : vector<1x4x384xf32> to vector<4x384xf32>
    %cst_5 = arith.constant dense<0.000000e+00> : vector<8x384xf32>
    %5 = tpu.matmul %2, %4, %cst_5 {dimension_numbers = #tpu.dot_dimension_numbers<[1], [0], [0], [1], [0, 0, 1, 1], [], []>} : vector<8x4xf32>, vector<4x384xf32>, vector<8x384xf32> -> vector<8x384xf32>
    %6 = arith.addf %0, %5 : vector<8x384xf32>
    %c1 = arith.constant 1 : index
    %c0_6 = arith.constant 0 : index
    %c0_7 = arith.constant 0 : index
    %7 = vector.load %arg2[%c1, %c0_6, %c0_7] : memref<9x8x4xf32, #tpu.memory_space<vmem>>, vector<1x8x4xf32>
    %8 = vector.shape_cast %7 : vector<1x8x4xf32> to vector<8x4xf32>
    %c0_8 = arith.constant 0 : index
    %c0_9 = arith.constant 0 : index
    %c1_10 = arith.constant 1 : index
    %9 = vector.load %arg1[%c0_8, %c0_9, %c1_10] : memref<1x4x512xf32, #tpu.memory_space<vmem>>, vector<1x4x384xf32>
    %10 = vector.shape_cast %9 : vector<1x4x384xf32> to vector<4x384xf32>
    %cst_11 = arith.constant dense<0.000000e+00> : vector<8x384xf32>
    %11 = tpu.matmul %8, %10, %cst_11 {dimension_numbers = #tpu.dot_dimension_numbers<[1], [0], [0], [1], [0, 0, 1, 1], [], []>} : vector<8x4xf32>, vector<4x384xf32>, vector<8x384xf32> -> vector<8x384xf32>
    %12 = arith.addf %6, %11 : vector<8x384xf32>
    %c2 = arith.constant 2 : index
    %c0_12 = arith.constant 0 : index
    %c0_13 = arith.constant 0 : index
    %13 = vector.load %arg2[%c2, %c0_12, %c0_13] : memref<9x8x4xf32, #tpu.memory_space<vmem>>, vector<1x8x4xf32>
    %14 = vector.shape_cast %13 : vector<1x8x4xf32> to vector<8x4xf32>
    %c0_14 = arith.constant 0 : index
    %c0_15 = arith.constant 0 : index
    %c2_16 = arith.constant 2 : index
    %15 = vector.load %arg1[%c0_14, %c0_15, %c2_16] : memref<1x4x512xf32, #tpu.memory_space<vmem>>, vector<1x4x384xf32>
    %16 = vector.shape_cast %15 : vector<1x4x384xf32> to vector<4x384xf32>
    %cst_17 = arith.constant dense<0.000000e+00> : vector<8x384xf32>
    %17 = tpu.matmul %14, %16, %cst_17 {dimension_numbers = #tpu.dot_dimension_numbers<[1], [0], [0], [1], [0, 0, 1, 1], [], []>} : vector<8x4xf32>, vector<4x384xf32>, vector<8x384xf32> -> vector<8x384xf32>
    %18 = arith.addf %12, %17 : vector<8x384xf32>
    %c3 = arith.constant 3 : index
    %c0_18 = arith.constant 0 : index
    %c0_19 = arith.constant 0 : index
    %19 = vector.load %arg2[%c3, %c0_18, %c0_19] : memref<9x8x4xf32, #tpu.memory_space<vmem>>, vector<1x8x4xf32>
    %20 = vector.shape_cast %19 : vector<1x8x4xf32> to vector<8x4xf32>
    %c0_20 = arith.constant 0 : index
    %c0_21 = arith.constant 0 : index
    %c18 = arith.constant 18 : index
    %21 = vector.load %arg1[%c0_20, %c0_21, %c18] : memref<1x4x512xf32, #tpu.memory_space<vmem>>, vector<1x4x384xf32>
    %22 = vector.shape_cast %21 : vector<1x4x384xf32> to vector<4x384xf32>
    %cst_22 = arith.constant dense<0.000000e+00> : vector<8x384xf32>
    %23 = tpu.matmul %20, %22, %cst_22 {dimension_numbers = #tpu.dot_dimension_numbers<[1], [0], [0], [1], [0, 0, 1, 1], [], []>} : vector<8x4xf32>, vector<4x384xf32>, vector<8x384xf32> -> vector<8x384xf32>
    %24 = arith.addf %18, %23 : vector<8x384xf32>
    %c4 = arith.constant 4 : index
    %c0_23 = arith.constant 0 : index
    %c0_24 = arith.constant 0 : index
    %25 = vector.load %arg2[%c4, %c0_23, %c0_24] : memref<9x8x4xf32, #tpu.memory_space<vmem>>, vector<1x8x4xf32>
    %26 = vector.shape_cast %25 : vector<1x8x4xf32> to vector<8x4xf32>
    %c0_25 = arith.constant 0 : index
    %c0_26 = arith.constant 0 : index
    %c19 = arith.constant 19 : index
    %27 = vector.load %arg1[%c0_25, %c0_26, %c19] : memref<1x4x512xf32, #tpu.memory_space<vmem>>, vector<1x4x384xf32>
    %28 = vector.shape_cast %27 : vector<1x4x384xf32> to vector<4x384xf32>
    %cst_27 = arith.constant dense<0.000000e+00> : vector<8x384xf32>
    %29 = tpu.matmul %26, %28, %cst_27 {dimension_numbers = #tpu.dot_dimension_numbers<[1], [0], [0], [1], [0, 0, 1, 1], [], []>} : vector<8x4xf32>, vector<4x384xf32>, vector<8x384xf32> -> vector<8x384xf32>
    %30 = arith.addf %24, %29 : vector<8x384xf32>
    %c5 = arith.constant 5 : index
    %c0_28 = arith.constant 0 : index
    %c0_29 = arith.constant 0 : index
    %31 = vector.load %arg2[%c5, %c0_28, %c0_29] : memref<9x8x4xf32, #tpu.memory_space<vmem>>, vector<1x8x4xf32>
    %32 = vector.shape_cast %31 : vector<1x8x4xf32> to vector<8x4xf32>
    %c0_30 = arith.constant 0 : index
    %c0_31 = arith.constant 0 : index
    %c20 = arith.constant 20 : index
    %33 = vector.load %arg1[%c0_30, %c0_31, %c20] : memref<1x4x512xf32, #tpu.memory_space<vmem>>, vector<1x4x384xf32>
    %34 = vector.shape_cast %33 : vector<1x4x384xf32> to vector<4x384xf32>
    %cst_32 = arith.constant dense<0.000000e+00> : vector<8x384xf32>
    %35 = tpu.matmul %32, %34, %cst_32 {dimension_numbers = #tpu.dot_dimension_numbers<[1], [0], [0], [1], [0, 0, 1, 1], [], []>} : vector<8x4xf32>, vector<4x384xf32>, vector<8x384xf32> -> vector<8x384xf32>
    %36 = arith.addf %30, %35 : vector<8x384xf32>
    %c6 = arith.constant 6 : index
    %c0_33 = arith.constant 0 : index
    %c0_34 = arith.constant 0 : index
    %37 = vector.load %arg2[%c6, %c0_33, %c0_34] : memref<9x8x4xf32, #tpu.memory_space<vmem>>, vector<1x8x4xf32>
    %38 = vector.shape_cast %37 : vector<1x8x4xf32> to vector<8x4xf32>
    %c0_35 = arith.constant 0 : index
    %c0_36 = arith.constant 0 : index
    %c36 = arith.constant 36 : index
    %39 = vector.load %arg1[%c0_35, %c0_36, %c36] : memref<1x4x512xf32, #tpu.memory_space<vmem>>, vector<1x4x384xf32>
    %40 = vector.shape_cast %39 : vector<1x4x384xf32> to vector<4x384xf32>
    %cst_37 = arith.constant dense<0.000000e+00> : vector<8x384xf32>
    %41 = tpu.matmul %38, %40, %cst_37 {dimension_numbers = #tpu.dot_dimension_numbers<[1], [0], [0], [1], [0, 0, 1, 1], [], []>} : vector<8x4xf32>, vector<4x384xf32>, vector<8x384xf32> -> vector<8x384xf32>
    %42 = arith.addf %36, %41 : vector<8x384xf32>
    %c7 = arith.constant 7 : index
    %c0_38 = arith.constant 0 : index
    %c0_39 = arith.constant 0 : index
    %43 = vector.load %arg2[%c7, %c0_38, %c0_39] : memref<9x8x4xf32, #tpu.memory_space<vmem>>, vector<1x8x4xf32>
    %44 = vector.shape_cast %43 : vector<1x8x4xf32> to vector<8x4xf32>
    %c0_40 = arith.constant 0 : index
    %c0_41 = arith.constant 0 : index
    %c37 = arith.constant 37 : index
    %45 = vector.load %arg1[%c0_40, %c0_41, %c37] : memref<1x4x512xf32, #tpu.memory_space<vmem>>, vector<1x4x384xf32>
    %46 = vector.shape_cast %45 : vector<1x4x384xf32> to vector<4x384xf32>
    %cst_42 = arith.constant dense<0.000000e+00> : vector<8x384xf32>
    %47 = tpu.matmul %44, %46, %cst_42 {dimension_numbers = #tpu.dot_dimension_numbers<[1], [0], [0], [1], [0, 0, 1, 1], [], []>} : vector<8x4xf32>, vector<4x384xf32>, vector<8x384xf32> -> vector<8x384xf32>
    %48 = arith.addf %42, %47 : vector<8x384xf32>
    %c8 = arith.constant 8 : index
    %c0_43 = arith.constant 0 : index
    %c0_44 = arith.constant 0 : index
    %49 = vector.load %arg2[%c8, %c0_43, %c0_44] : memref<9x8x4xf32, #tpu.memory_space<vmem>>, vector<1x8x4xf32>
    %50 = vector.shape_cast %49 : vector<1x8x4xf32> to vector<8x4xf32>
    %c0_45 = arith.constant 0 : index
    %c0_46 = arith.constant 0 : index
    %c38 = arith.constant 38 : index
    %51 = vector.load %arg1[%c0_45, %c0_46, %c38] : memref<1x4x512xf32, #tpu.memory_space<vmem>>, vector<1x4x384xf32>
    %52 = vector.shape_cast %51 : vector<1x4x384xf32> to vector<4x384xf32>
    %cst_47 = arith.constant dense<0.000000e+00> : vector<8x384xf32>
    %53 = tpu.matmul %50, %52, %cst_47 {dimension_numbers = #tpu.dot_dimension_numbers<[1], [0], [0], [1], [0, 0, 1, 1], [], []>} : vector<8x4xf32>, vector<4x384xf32>, vector<8x384xf32> -> vector<8x384xf32>
    %54 = arith.addf %48, %53 : vector<8x384xf32>
    %c0_48 = arith.constant 0 : index
    %c0_49 = arith.constant 0 : index
    %55 = vector.load %arg3[%c0_48, %c0_49] : memref<8x1xf32, #tpu.memory_space<vmem>>, vector<8x1xf32>
    %56 = vector.broadcast %55 : vector<8x1xf32> to vector<8x384xf32>
    %57 = arith.addf %54, %56 : vector<8x384xf32>
    %c0_50 = arith.constant 0 : index
    %c0_51 = arith.constant 0 : index
    %c0_52 = arith.constant 0 : index
    %58 = vector.load %arg4[%c0_50, %c0_51, %c0_52] : memref<1x8x384xf32, #tpu.memory_space<vmem>>, vector<1x8x384xf32>
    %59 = vector.shape_cast %58 : vector<1x8x384xf32> to vector<8x384xf32>
    %60 = vector.shape_cast %57 : vector<8x384xf32> to vector<1x8x384xf32>
    tpu.vector_store %arg4[%c0_50, %c0_51, %c0_52], %60 {strides = array<i32>} : memref<1x8x384xf32, #tpu.memory_space<vmem>>, vector<1x8x384xf32>,
    return
  }
  func.func @transform_0(%arg0: i32) -> (i32, i32, i32) {
    %c0_i32 = arith.constant 0 : i32
    %c0_i32_0 = arith.constant 0 : i32
    %c0_i32_1 = arith.constant 0 : i32
    return %arg0, %c0_i32, %c0_i32_0 : i32, i32, i32
  }
  func.func @transform_1(%arg0: i32) -> (i32, i32, i32) {
    %c0_i32 = arith.constant 0 : i32
    %c0_i32_0 = arith.constant 0 : i32
    %c0_i32_1 = arith.constant 0 : i32
    %c0_i32_2 = arith.constant 0 : i32
    return %c0_i32, %c0_i32_0, %c0_i32_1 : i32, i32, i32
  }
  func.func @transform_2(%arg0: i32) -> (i32, i32) {
    %c0_i32 = arith.constant 0 : i32
    %c0_i32_0 = arith.constant 0 : i32
    %c0_i32_1 = arith.constant 0 : i32
    return %c0_i32, %c0_i32_0 : i32, i32
  }
  func.func @transform_3(%arg0: i32) -> (i32, i32, i32) {
    %c0_i32 = arith.constant 0 : i32
    %c0_i32_0 = arith.constant 0 : i32
    %c0_i32_1 = arith.constant 0 : i32
    return %arg0, %c0_i32, %c0_i32_0 : i32, i32, i32
  }
}

</mosaic_0001>

<bundles_post_ra>
// kernel: tpu_custom_call.1
= control target key start
LH: loop header
LB: loop body
LE: loop exit
PB: predicated region body
PF: predicated region fallthrough
CT: control target
= control target key end

     0   :  { %8 = vsyncpa [#allocation3], 0  ;;  %s2298_s0 = inlined_call_operand.vmem [shape: f32[2,4,512], index: 0, kind: input, shape index: {}]   ;;  %s2299_s1 = inlined_call_operand.vmem [shape: f32[9,8,4], index: 1, kind: input, shape index: {}]   ;;  %s2300_s2 = inlined_call_operand.vmem [shape: f32[8,1], index: 2, kind: input, shape index: {}]   ;;  %s2301_s3 = inlined_call_operand.hbm [shape: f32[2,8,384], index: 3, kind: output, shape index: {}]  }
   0x1   :  { %10 = vsyncpa [#allocation3 + $0x1], 0  ;;  %s2069_s12 = smov 0   ;;  %s2071_s13 = smov 0  }
   0x2   :  { %s2073_s14 = smov 0   ;;  %s2075_s15 = smov 0  }
   0x3 LB: > { %s2090_s16 = sadd.s32 4294967295, %s2035_s15   ;;  %s1794_s17 = sadd.s32 4294967294, %s2035_s15   ;;  %s2035_s15 = sphi %s2075_s15, %s2307_s15   ;;  %s2031_s14 = sphi %s2073_s14, %s2306_s14   ;;  %s2027_s13 = sphi %s2071_s13, %s2305_s13   ;;  %s2023_s12 = sphi %s2069_s12, %s2304_s12  }
   0x4   : > { %s2094_s18 = sadd.s32 1, %s2035_s15   ;;  %s91_s19 = sadd.s32 1, %s2031_s14 }
   0x5   : > { %s88_s20 = ssub.s32 %s2035_s15, %s2094_s18  ;;  %p101_p0 = scmp.ne.s32.totalorder %s2031_s14, %s2027_s13 }
   0x6   : > { %p89_p1 = scmp.eq.s32.totalorder %s88_s20, 0  ;;  %p102_p2 = scmp.eq.s32.totalorder %s2090_s16, 1 }
   0x7   : > { %p107_p3 = scmp.ne.s32.totalorder %s2027_s13, %s2023_s12  ;;  %p108_p4 = scmp.eq.s32.totalorder %s1794_s17, 1 }
   0x8   : > { %s2105_s21 = scalar_select %p89_p1, %s2031_s14, %s91_s19  }
   0x9   : > { %p2107_p5 = por %p102_p2, %p101_p0  ;;  %p2111_p6 = por %p108_p4, %p107_p3 }
   0xa   : > { %p1797_p7 = scmp.ge.s32.totalorder %s2035_s15, 1  ;;  %p140_p8 = scmp.lt.s32.totalorder %s2035_s15, 3 }
   0xc   : > { %p141_p9 = pnand %p1797_p7, %p140_p8 }
   0xd   : > { %p164_p10 = scmp.lt.s32.totalorder (!%p141_p9), %s2090_s16, 1  ;;  %s2039_s29 = smov (!%p141_p9), 127  }
   0xe   : > { %144 = sbr.rel (%p141_p9) target bundleno = 413 (0x19d), region = 32  ;;  %s2040_s30 = smov (!%p141_p9), 126  }
   0xf   : > { %s2041_s4 = smov (!%p141_p9), 110   ;;  %s2042_s5 = smov (!%p141_p9), 109  }
  0x10   : > { %s2043_s6 = smov (!%p141_p9), 108   ;;  %s2044_s7 = smov (!%p141_p9), 92  }
  0x11   : > { %s2045_s8 = smov (!%p141_p9), 91   ;;  %s2047_s9 = smov (!%p141_p9), 90  }
  0x12   : > { %s161_s17 = sand.u32 (!%p141_p9), 1, %s2027_s13   ;;  %s1921_s20 = smul.u32 (!%p141_p9), 384, %s2090_s16 }
  0x13   : > { %v2037_v0 = vmov 0.0   ;;  %s165_s24 = scalar_select %p164_p10, %s2090_s16, 1  ;;  %vm2038_vm0 = vmmov 0   ;;  %v2046_v5 = vmov 0   ;;  %v1708_v6 = vld [vmem:[%s2300_s2] sm:$0xff]  ;;  %vm188_vm1 = vcmask 1039360  }
  0x14   : > { %267 = vmatprep.mubr.f32.mxu0 %v2037_v0  ;;  %1875 = vmatprep.subr.mxu1 %v2037_v0  ;;  %vm196_vm2 = vcmask 1043456   ;;  %v1800_v13 = vld [vmem:[%s2299_s1 + $0x8] sm:$0xff]  ;;  %vm192_vm3 = vcmask 31744   ;;  %vm513_vm4 = vcmask 1031168   ;;  %v169_v19 = vld [vmem:[%s2299_s1] sm:$0xff]  ;;  %vm686_vm5 = vcmask 900096  }
  0x15   : > { %1877 = vmatprep.mubr.msk.f32.mxu1 %vm2038_vm0, %v2037_v0  ;;  %s1856_s25 = sshll.u32 %s165_s24, 4  ;;  %1972 = vset.pattern.permute.xlu0 %v2046_v5  ;;  %v1811_v24 = vld [vmem:[%s2299_s1 + $0x10] sm:$0xff]  ;;  %v1817_v30 = vld [vmem:[%s2299_s1 + $0x18] sm:$0xff]  ;;  %vm859_vm6 = vcmask 891904   ;;  %v1823_v38 = vld [vmem:[%s2299_s1 + $0x20] sm:$0xff]  ;;  %vm1032_vm7 = vcmask 883712  }
  0x16   : > { %s2126_s28 = scalar_lea.vmem %s2298_s0, %s1856_s25  ;;  %v1829_v46 = vld [vmem:[%s2299_s1 + $0x28] sm:$0xff]  ;;  %vm1205_vm8 = vcmask 752640   ;;  %v1835_v54 = vld [vmem:[%s2299_s1 + $0x30] sm:$0xff]  ;;  %vm1378_vm9 = vcmask 744448   ;;  %v1841_v62 = vld [vmem:[%s2299_s1 + $0x38] sm:$0xff]  ;;  %vm1551_vm10 = vcmask 736256  }
  0x17   : > { %v175_v1 = vld [vmem:[%s2126_s28 + $0x8] sm:$0xff]  ;;  %v2130_v2 = vld [vmem:[%s2126_s28] sm:$0xff]  ;;  %s1920_s19 = smul.u32 24, %s161_s17 }
  0x18   : > { %184 = vrot.lane.b32.xlu0 %v175_v1, %s2039_s29  ;;  %180 = vrot.lane.b32.xlu1 %v2130_v2, %s2039_s29  ;;  %v178_v3 = vcombine.high %v2130_v2, %v2130_v2  ;;  %v179_v4 = vcombine.high %v175_v1, %v175_v1  ;;  %v171_v18 = vld [vmem:[%s2126_s28 + $0x8] sm:$0xf]  ;;  %s1733_s28 = scalar_lea.hbm %s2301_s3, %s1921_s20 }
  0x19   : > { %s163_s24 = scalar_lea.vmem [#allocation2], %s1920_s19 }
  0x1a   : > { %s1735_s25 = sshll.u32 %s163_s24, 4  ;;  %s1736_s25 = int_to_ptr.vmem [resolvable:$true] %s1735_s25 }
  0x1b   : > { %s1975_s16 = scalar_lea.vmem %s1736_s25, 384 }
  0x1c   : > { %509 = vrot.lane.b32.xlu1 %v175_v1, %s2040_s30  ;;  %182 = vrot.lane.b32.xlu0 %v178_v3, %s2039_s29  ;;  %p1976_p11 = scmp.ne.s32.totalorder %s1736_s25, %s1975_s16 }
  0x1e   : > { %p1977_p12 = pnand %p1976_p11, %p2107_p5 }
  0x20   : > { %186 = vrot.lane.b32.xlu1 %v179_v4, %s2039_s29  ;;  %507 = vrot.lane.b32.xlu0 %v178_v3, %s2040_s30  ;;  %s1721_s29 = scalar_lea.sflag [#allocation3], %s161_s17  ;;  %p1978_p13 = pneg %p1977_p12 }
  0x24   : > { %511 = vrot.lane.b32.xlu1 %v179_v4, %s2040_s30  ;;  %505 = vrot.lane.b32.xlu0 %v2130_v2, %s2040_s30  ;;  %s2048_s30 = smov [#allocation2]  }
  0x28   : > { %682 = vrot.lane.b32.xlu1 %v175_v1, %s2041_s4  ;;  %680 = vrot.lane.b32.xlu0 %v178_v3, %s2041_s4 }
  0x2c   : > { %684 = vrot.lane.b32.xlu1 %v179_v4, %s2041_s4  ;;  %678 = vrot.lane.b32.xlu0 %v2130_v2, %s2041_s4  ;;  %s1979_s4 = sshll.u32 %s2048_s30, 4  ;;  %s1980_s4 = int_to_ptr.vmem [resolvable:$false] %s1979_s4 }
  0x2d   : > { %p1982_p0 = scmp.lt.s32.totalorder %s1736_s25, %s1980_s4 }
  0x30   : > { %855 = vrot.lane.b32.xlu1 %v175_v1, %s2042_s5  ;;  %853 = vrot.lane.b32.xlu0 %v178_v3, %s2042_s5 }
  0x34   : > { %857 = vrot.lane.b32.xlu1 %v179_v4, %s2042_s5  ;;  %851 = vrot.lane.b32.xlu0 %v2130_v2, %s2042_s5  ;;  %s1981_s5 = scalar_lea.vmem %s1980_s4, 768 }
  0x35   : > { %p1983_p1 = scmp.lt.s32.totalorder %s1981_s5, %s1975_s16 }
  0x37   : > { %p1984_p2 = por %p1983_p1, %p1982_p0 }
  0x38   : > { %1028 = vrot.lane.b32.xlu1 %v175_v1, %s2043_s6  ;;  %1026 = vrot.lane.b32.xlu0 %v178_v3, %s2043_s6 }
  0x39   : > { %p1985_p3 = pnand %p1984_p2, %p1978_p13 }
  0x3c   : > { %1030 = vrot.lane.b32.xlu1 %v179_v4, %s2043_s6  ;;  %1024 = vrot.lane.b32.xlu0 %v2130_v2, %s2043_s6 }
  0x40   : > { %1201 = vrot.lane.b32.xlu1 %v175_v1, %s2044_s7  ;;  %1199 = vrot.lane.b32.xlu0 %v178_v3, %s2044_s7 }
  0x44   : > { %1203 = vrot.lane.b32.xlu1 %v179_v4, %s2044_s7  ;;  %1197 = vrot.lane.b32.xlu0 %v2130_v2, %s2044_s7 }
  0x48   : > { %1374 = vrot.lane.b32.xlu1 %v175_v1, %s2045_s8  ;;  %1372 = vrot.lane.b32.xlu0 %v178_v3, %s2045_s8 }
  0x4c   : > { %1376 = vrot.lane.b32.xlu1 %v179_v4, %s2045_s8  ;;  %1370 = vrot.lane.b32.xlu0 %v2130_v2, %s2045_s8 }
  0x50   : > { %1547 = vrot.lane.b32.xlu1 %v175_v1, %s2047_s9  ;;  %1545 = vrot.lane.b32.xlu0 %v178_v3, %s2047_s9 }
  0x54   : > { %1549 = vrot.lane.b32.xlu1 %v179_v4, %s2047_s9  ;;  %1543 = vrot.lane.b32.xlu0 %v2130_v2, %s2047_s9 }
  0x58   : > { %1711 = vperm.xlu0 %1972, %v1708_v6  }
  0x8a   : > { %v185_v7 = vpop.permute.xlu0 %184  ;;  %v181_v8 = vpop.permute.xlu1 %180 }
  0x8e   : > { %v510_v9 = vpop.permute.xlu1 %509  ;;  %v183_v10 = vpop.permute.xlu0 %182 }
  0x8f   : > { %v190_v11 = vsel %vm188_vm1, %v183_v10, %v185_v7  ;;  %v189_v12 = vsel %vm188_vm1, %v181_v8, %v183_v10 }
  0x90   : > { %1801 = vmatprep.subr.msk.mxu0 %vm196_vm2, %v190_v11 }
  0x91   : > { %1802 = vmatpush1.msk.msra.mxu0 %vm196_vm2, %v189_v12 }
  0x92   : > { %v187_v14 = vpop.permute.xlu1 %186  ;;  %v508_v15 = vpop.permute.xlu0 %507  ;;  %1806 = vmatprep.subr.msk.mxu0 %vm196_vm2, %v178_v3  ;;  %1803 = vmatmul.mubr.msk.f32.vlgmr.msra.gmra.mxu0 %vm192_vm3, %v1800_v13 }
  0x93   : > { %v515_v16 = vsel %vm513_vm4, %v508_v15, %v510_v9  ;;  %1807 = vmatpush1.msk.msra.mxu0 %vm196_vm2, %v2130_v2  ;;  %v191_v17 = vsel %vm188_vm1, %v185_v7, %v187_v14  ;;  %420 = vmatprep.mubr.f32.mxu0 %v2037_v0  ;;  %v1847_v7 = vld [vmem:[%s2299_s1 + $0x40] sm:$0xff] }
  0x94   : > { %1876 = vmatpush3.msk.msra.mxu1 %vm196_vm2, %v191_v17  ;;  %1812 = vmatprep.subr.msk.mxu0 %vm196_vm2, %v515_v16 }
  0x95   : > { %1878 = vmatmul.mubr.msk.f32.vlgmr.msra.gmra.mxu1 %vm192_vm3, %v1800_v13  ;;  %1880 = vmatprep.subr.mxu1 %v2037_v0 }
  0x96   : > { %v512_v20 = vpop.permute.xlu1 %511  ;;  %v506_v21 = vpop.permute.xlu0 %505  ;;  %1881 = vmatpush3.msk.msra.mxu1 %vm196_vm2, %v171_v18  ;;  %1808 = vmatmul.mubr.msk.f32.vlgmr.msra.gmra.mxu0 %vm192_vm3, %v169_v19 }
  0x97   : > { %v516_v22 = vsel %vm513_vm4, %v510_v9, %v512_v20  ;;  %v514_v23 = vsel %vm513_vm4, %v506_v21, %v508_v15  ;;  %1882 = vmatprep.mubr.msk.f32.mxu1 %vm2038_vm0, %v2037_v0  ;;  %1885 = vmatprep.subr.mxu1 %v2037_v0 }
  0x98   : > { %1813 = vmatpush1.msk.msra.mxu0 %vm196_vm2, %v514_v23  ;;  %590 = vmatprep.mubr.f32.mxu0 %v2037_v0 }
  0x99   : > { %1883 = vmatmul.mubr.msk.f32.vlgmr.msra.gmra.mxu1 %vm192_vm3, %v169_v19 }
  0x9a   : > { %1886 = vmatpush3.msk.msra.mxu1 %vm196_vm2, %v516_v22  ;;  %v683_v25 = vpop.permute.xlu1 %682  ;;  %v681_v26 = vpop.permute.xlu0 %680  ;;  %1887 = vmatprep.mubr.msk.f32.mxu1 %vm2038_vm0, %v2037_v0 }
  0x9b   : > { %v688_v27 = vsel %vm686_vm5, %v681_v26, %v683_v25  ;;  %1890 = vmatprep.subr.mxu1 %v2037_v0  ;;  %1814 = vmatmul.mubr.msk.f32.vlgmr.msra.gmra.mxu0 %vm192_vm3, %v1811_v24 }
  0x9c   : > { %1818 = vmatprep.subr.msk.mxu0 %vm196_vm2, %v688_v27  ;;  %763 = vmatprep.mubr.f32.mxu0 %v2037_v0 }
  0x9d   : > { %1888 = vmatmul.mubr.msk.f32.vlgmr.msra.gmra.mxu1 %vm192_vm3, %v1811_v24 }
  0x9e   : > { %v685_v28 = vpop.permute.xlu1 %684  ;;  %v679_v29 = vpop.permute.xlu0 %678  ;;  %1892 = vmatprep.mubr.msk.f32.mxu1 %vm2038_vm0, %v2037_v0 }
  0x9f   : > { %v689_v31 = vsel %vm686_vm5, %v683_v25, %v685_v28  ;;  %v687_v32 = vsel %vm686_vm5, %v679_v29, %v681_v26 }
  0xa0   : > { %1819 = vmatpush1.msk.msra.mxu0 %vm196_vm2, %v687_v32  ;;  %1891 = vmatpush3.msk.msra.mxu1 %vm196_vm2, %v689_v31 }
  0xa1   : > { %1895 = vmatprep.subr.mxu1 %v2037_v0  ;;  %1820 = vmatmul.mubr.msk.f32.vlgmr.msra.gmra.mxu0 %vm192_vm3, %v1817_v30 }
  0xa2   : > { %v856_v33 = vpop.permute.xlu1 %855  ;;  %v854_v34 = vpop.permute.xlu0 %853  ;;  %1893 = vmatmul.mubr.msk.f32.vlgmr.msra.gmra.mxu1 %vm192_vm3, %v1817_v30  ;;  %936 = vmatprep.mubr.f32.mxu0 %v2037_v0 }
  0xa3   : > { %v861_v35 = vsel %vm859_vm6, %v854_v34, %v856_v33  ;;  %1897 = vmatprep.mubr.msk.f32.mxu1 %vm2038_vm0, %v2037_v0 }
  0xa4   : > { %1824 = vmatprep.subr.msk.mxu0 %vm196_vm2, %v861_v35 }
  0xa6   : > { %v858_v36 = vpop.permute.xlu1 %857  ;;  %v852_v37 = vpop.permute.xlu0 %851 }
  0xa7   : > { %v862_v39 = vsel %vm859_vm6, %v856_v33, %v858_v36  ;;  %v860_v40 = vsel %vm859_vm6, %v852_v37, %v854_v34 }
  0xa8   : > { %1825 = vmatpush1.msk.msra.mxu0 %vm196_vm2, %v860_v40  ;;  %1896 = vmatpush3.msk.msra.mxu1 %vm196_vm2, %v862_v39 }
  0xa9   : > { %1826 = vmatmul.mubr.msk.f32.vlgmr.msra.gmra.mxu0 %vm192_vm3, %v1823_v38  ;;  %1900 = vmatprep.subr.mxu1 %v2037_v0 }
  0xaa   : > { %v1029_v41 = vpop.permute.xlu1 %1028  ;;  %v1027_v42 = vpop.permute.xlu0 %1026  ;;  %1898 = vmatmul.mubr.msk.f32.vlgmr.msra.gmra.mxu1 %vm192_vm3, %v1823_v38  ;;  %1109 = vmatprep.mubr.f32.mxu0 %v2037_v0 }
  0xab   : > { %v1034_v43 = vsel %vm1032_vm7, %v1027_v42, %v1029_v41  ;;  %1902 = vmatprep.mubr.msk.f32.mxu1 %vm2038_vm0, %v2037_v0 }
  0xac   : > { %1830 = vmatprep.subr.msk.mxu0 %vm196_vm2, %v1034_v43 }
  0xae   : > { %v1031_v44 = vpop.permute.xlu1 %1030  ;;  %v1025_v45 = vpop.permute.xlu0 %1024 }
  0xaf   : > { %v1035_v47 = vsel %vm1032_vm7, %v1029_v41, %v1031_v44  ;;  %v1033_v48 = vsel %vm1032_vm7, %v1025_v45, %v1027_v42 }
  0xb0   : > { %1831 = vmatpush1.msk.msra.mxu0 %vm196_vm2, %v1033_v48  ;;  %1901 = vmatpush3.msk.msra.mxu1 %vm196_vm2, %v1035_v47 }
  0xb1   : > { %1832 = vmatmul.mubr.msk.f32.vlgmr.msra.gmra.mxu0 %vm192_vm3, %v1829_v46  ;;  %1903 = vmatmul.mubr.msk.f32.vlgmr.msra.gmra.mxu1 %vm192_vm3, %v1829_v46 }
  0xb2   : > { %v1202_v49 = vpop.permute.xlu1 %1201  ;;  %v1200_v50 = vpop.permute.xlu0 %1199  ;;  %1905 = vmatprep.subr.mxu1 %v2037_v0  ;;  %1282 = vmatprep.mubr.f32.mxu0 %v2037_v0 }
  0xb3   : > { %v1207_v51 = vsel %vm1205_vm8, %v1200_v50, %v1202_v49  ;;  %1907 = vmatprep.mubr.msk.f32.mxu1 %vm2038_vm0, %v2037_v0 }
  0xb4   : > { %1836 = vmatprep.subr.msk.mxu0 %vm196_vm2, %v1207_v51 }
  0xb6   : > { %v1204_v52 = vpop.permute.xlu1 %1203  ;;  %v1198_v53 = vpop.permute.xlu0 %1197 }
  0xb7   : > { %v1208_v55 = vsel %vm1205_vm8, %v1202_v49, %v1204_v52  ;;  %v1206_v56 = vsel %vm1205_vm8, %v1198_v53, %v1200_v50 }
  0xb8   : > { %1837 = vmatpush1.msk.msra.mxu0 %vm196_vm2, %v1206_v56  ;;  %1906 = vmatpush3.msk.msra.mxu1 %vm196_vm2, %v1208_v55 }
  0xb9   : > { %1838 = vmatmul.mubr.msk.f32.vlgmr.msra.gmra.mxu0 %vm192_vm3, %v1835_v54  ;;  %1908 = vmatmul.mubr.msk.f32.vlgmr.msra.gmra.mxu1 %vm192_vm3, %v1835_v54 }
  0xba   : > { %v1375_v57 = vpop.permute.xlu1 %1374  ;;  %v1373_v58 = vpop.permute.xlu0 %1372  ;;  %1910 = vmatprep.subr.mxu1 %v2037_v0  ;;  %1455 = vmatprep.mubr.f32.mxu0 %v2037_v0 }
  0xbb   : > { %v1380_v59 = vsel %vm1378_vm9, %v1373_v58, %v1375_v57  ;;  %1912 = vmatprep.mubr.msk.f32.mxu1 %vm2038_vm0, %v2037_v0 }
  0xbc   : > { %1842 = vmatprep.subr.msk.mxu0 %vm196_vm2, %v1380_v59 }
  0xbe   : > { %v1377_v60 = vpop.permute.xlu1 %1376  ;;  %v1371_v61 = vpop.permute.xlu0 %1370 }
  0xbf   : > { %v1381_v63 = vsel %vm1378_vm9, %v1375_v57, %v1377_v60  ;;  %v1379_v1 = vsel %vm1378_vm9, %v1371_v61, %v1373_v58 }
  0xc0   : > { %1843 = vmatpush1.msk.msra.mxu0 %vm196_vm2, %v1379_v1  ;;  %1911 = vmatpush3.msk.msra.mxu1 %vm196_vm2, %v1381_v63 }
  0xc1   : > { %1844 = vmatmul.mubr.msk.f32.vlgmr.msra.gmra.mxu0 %vm192_vm3, %v1841_v62  ;;  %1913 = vmatmul.mubr.msk.f32.vlgmr.msra.gmra.mxu1 %vm192_vm3, %v1841_v62 }
  0xc2   : > { %v1548_v2 = vpop.permute.xlu1 %1547  ;;  %v1546_v3 = vpop.permute.xlu0 %1545  ;;  %1915 = vmatprep.subr.mxu1 %v2037_v0  ;;  %1628 = vmatprep.mubr.f32.mxu0 %v2037_v0 }
  0xc3   : > { %v1553_v4 = vsel %vm1551_vm10, %v1546_v3, %v1548_v2  ;;  %1917 = vmatprep.mubr.msk.f32.mxu1 %vm2038_vm0, %v2037_v0 }
  0xc4   : > { %1848 = vmatprep.subr.msk.mxu0 %vm196_vm2, %v1553_v4 }
  0xc6   : > { %v1550_v5 = vpop.permute.xlu1 %1549  ;;  %v1544_v6 = vpop.permute.xlu0 %1543 }
  0xc7   : > { %v1554_v8 = vsel %vm1551_vm10, %v1548_v2, %v1550_v5  ;;  %v1552_v9 = vsel %vm1551_vm10, %v1544_v6, %v1546_v3 }
  0xc8   : > { %1849 = vmatpush1.msk.msra.mxu0 %vm196_vm2, %v1552_v9  ;;  %1916 = vmatpush3.msk.msra.mxu1 %vm196_vm2, %v1554_v8 }
  0xc9   : > { %1850 = vmatmul.mubr.msk.f32.vlgmr.msra.gmra.mxu0 %vm192_vm3, %v1847_v7  ;;  %1918 = vmatmul.mubr.msk.f32.vlgmr.msra.gmra.mxu1 %vm192_vm3, %v1847_v7 }
  0xd3   : > { %v1712_v61 = vpop.permute.xlu0 %1711 }
 0x152   : > { %v269_v10 = vpop.f32.mrf.mxu0 }
 0x154   : > { %v271_v0 = vpop.f32.mrf.mxu0 }
 0x155   : > { %v340_v11 = vpop.f32.mrf.mxu1 }
 0x156   : > { %v422_v12 = vpop.f32.mrf.mxu0 }
 0x157   : > { %v1879_v13 = vpop.f32.mrf.mxu1  ;;  %v423_v31 = vadd.f32 %v422_v12, %v269_v10 }
 0x158   : > { %v424_v15 = vpop.f32.mrf.mxu0 }
 0x159   : > { %v493_v14 = vpop.f32.mrf.mxu1  ;;  %v425_v34 = vadd.f32 %v424_v15, %v271_v0 }
 0x15a   : > { %v494_v32 = vadd.f32 %v493_v14, %v340_v11 }
 0x15b   : > { %v1884_v16 = vpop.f32.mrf.mxu1  ;;  %v592_v18 = vpop.f32.mrf.mxu0 }
 0x15c   : > { %v667_v35 = vadd.f32 %v592_v18, %v423_v31 }
 0x15d   : > { %v663_v17 = vpop.f32.mrf.mxu1  ;;  %v594_v21 = vpop.f32.mrf.mxu0 }
 0x15e   : > { %v669_v36 = vadd.f32 %v663_v17, %v494_v32  ;;  %v668_v40 = vadd.f32 %v594_v21, %v425_v34 }
 0x15f   : > { %v1889_v19 = vpop.f32.mrf.mxu1 }
 0x161   : > { %v765_v23 = vpop.f32.mrf.mxu0 }
 0x162   : > { %v836_v20 = vpop.f32.mrf.mxu1  ;;  %v840_v41 = vadd.f32 %v765_v23, %v667_v35 }
 0x163   : > { %v767_v25 = vpop.f32.mrf.mxu0  ;;  %v842_v42 = vadd.f32 %v836_v20, %v669_v36 }
 0x164   : > { %v1894_v22 = vpop.f32.mrf.mxu1  ;;  %v841_v44 = vadd.f32 %v767_v25, %v668_v40 }
 0x169   : > { %v938_v27 = vpop.f32.mrf.mxu0 }
 0x16a   : > { %v1009_v24 = vpop.f32.mrf.mxu1  ;;  %v1013_v45 = vadd.f32 %v938_v27, %v840_v41 }
 0x16b   : > { %v940_v29 = vpop.f32.mrf.mxu0  ;;  %v1015_v46 = vadd.f32 %v1009_v24, %v842_v42 }
 0x16c   : > { %v1899_v26 = vpop.f32.mrf.mxu1  ;;  %v1014_v51 = vadd.f32 %v940_v29, %v841_v44 }
 0x171   : > { %v1182_v28 = vpop.f32.mrf.mxu1  ;;  %v1111_v33 = vpop.f32.mrf.mxu0 }
 0x172   : > { %v1186_v52 = vadd.f32 %v1111_v33, %v1013_v45  ;;  %v1188_v53 = vadd.f32 %v1182_v28, %v1015_v46 }
 0x173   : > { %v1904_v30 = vpop.f32.mrf.mxu1  ;;  %v1113_v38 = vpop.f32.mrf.mxu0 }
 0x174   : > { %v1187_v54 = vadd.f32 %v1113_v38, %v1014_v51 }
 0x179   : > { %v1355_v37 = vpop.f32.mrf.mxu1  ;;  %v1284_v43 = vpop.f32.mrf.mxu0 }
 0x17a   : > { %v1359_v55 = vadd.f32 %v1284_v43, %v1186_v52  ;;  %v1361_v56 = vadd.f32 %v1355_v37, %v1188_v53 }
 0x17b   : > { %v1909_v39 = vpop.f32.mrf.mxu1  ;;  %v1286_v47 = vpop.f32.mrf.mxu0 }
 0x17c   : > { %v1360_v58 = vadd.f32 %v1286_v47, %v1187_v54 }
 0x181   : > { %v1528_v48 = vpop.f32.mrf.mxu1  ;;  %v1457_v49 = vpop.f32.mrf.mxu0 }
 0x182   : > { %v1532_v59 = vadd.f32 %v1457_v49, %v1359_v55  ;;  %v1534_v60 = vadd.f32 %v1528_v48, %v1361_v56 }
 0x183   : > { %v1914_v50 = vpop.f32.mrf.mxu1  ;;  %v1459_v57 = vpop.f32.mrf.mxu0 }
 0x184   : > { %v1533_v1 = vadd.f32 %v1459_v57, %v1360_v58 }
 0x189   : > { %v1630_v62 = vpop.f32.mrf.mxu0  ;;  %v1701_v63 = vpop.f32.mrf.mxu1 }
 0x18a   : > { %v1705_v2 = vadd.f32 %v1630_v62, %v1532_v59  ;;  %v1707_v3 = vadd.f32 %v1701_v63, %v1534_v60 }
 0x18b   : > { %v1632_v4 = vpop.f32.mrf.mxu0  ;;  %v1919_v5 = vpop.f32.mrf.mxu1 }
 0x18c   : > { %v1714_v6 = vadd.f32 %v1712_v61, %v1705_v2  ;;  %v1716_v7 = vadd.f32 %v1712_v61, %v1707_v3  ;;  %v1706_v8 = vadd.f32 %v1632_v4, %v1533_v1 }
 0x18e   : > { %1717 = vst [vmem:[%s163_s24] sm:$0xff] %v1714_v6  ;;  %1719 = vst [vmem:[%s163_s24 + $0x10] sm:$0xff] %v1716_v7  ;;  %v1715_v9 = vadd.f32 %v1712_v61, %v1706_v8 }
 0x190   : > { %1718 = vst [vmem:[%s163_s24 + $0x8] sm:$0xff] %v1715_v9 }
 0x191   : > { %1988 = shalt.err (!%p1985_p3)
}
 0x192   : > { %s1989_s6 = scalar_lea.hbm %s1733_s28, 384  ;;  %s1993_s9 = scalar_lea.hbm %s2301_s3, 768 }
 0x193   : > { %p1990_p4 = scmp.ne.s32.totalorder %s1733_s28, %s1989_s6  ;;  %p1994_p9 = scmp.lt.s32.totalorder %s1733_s28, %s2301_s3 }
 0x194   : > { %p1995_p10 = scmp.lt.s32.totalorder %s1993_s9, %s1989_s6 }
 0x195   : > { %p1991_p7 = pnand %p1990_p4, %p2107_p5 }
 0x196   : > { %p1996_p11 = por %p1995_p10, %p1994_p9 }
 0x197   : > { %p1992_p8 = pneg %p1991_p7 }
 0x199   : > { %p1997_p12 = pnand %p1996_p11, %p1992_p8 }
 0x19b   : > { %2000 = shalt.err (!%p1997_p12)
}
 0x19c   : > { %1922 = dma.vmem_to_hbm [thread:$0]  (%p2107_p5), %s1736_s25, 384, %s1733_s28, %s1721_s29  }
 0x19d PF: > { %p1928_p13 = scmp.ge.s32.totalorder %s2035_s15, 2  ;;  %s1747_s17 = sand.u32 1, %s2023_s12  }
 0x19e   : > { %s1748_s19 = scalar_lea.sflag [#allocation3], %s1747_s17 }
 0x19f   : > { %p1925_p0 = pnand %p1928_p13, %p2111_p6 }
 0x1a1   : > { %p1926_p1 = pneg %p1925_p0 }
 0x1a3   : > { %2018 = dma.done.wait (%p1926_p1), %s1748_s19, 384  }
 0x1a4   : > { %2020 = vsyncadd (%p1926_p1), %s1748_s19, 4294966912  ;;  %p13_p2 = scmp.ge.s32.totalorder %s2094_s18, 4   ;;  %s2304_s12 = smov %s2027_s13 }
 0x1a5   : > { %s2305_s13 = smov %s2031_s14  ;;  %s2306_s14 = smov %s2105_s21 }
 0x1a6   : > { %s2307_s15 = smov %s2094_s18  ;;  %15 = sbr.rel (!%p13_p2) target bundleno = 3 (0x3), region = 75 }
 0x1ab   :  { %1753 = vsyncpa [#allocation3], 1 }
 0x1ac   :  { %1755 = vsyncpa [#allocation3 + $0x1], 1 }

</bundles_post_ra>
